<compile_context>
chip_gen: v7x
topology: tpu7x:2x2x1
jax: 0.10.0
libtpu: 0.0.40
codegen_flags: <defaults>
</compile_context>

<pallas_src>
import math

import jax
import jax.numpy as jnp
from jax.experimental import pallas as pl
from jax.experimental.pallas import tpu as pltpu


def lstm_kernel(packed_ref, out_ref):
    """packed_ref rows: [0:seq]   = x (padded to 4H cols, only first I valid)
                        [seq:+I]  = W_ih^T
                        [..:+H]   = W_hh^T
                        [last]    = b_ih + b_hh
    out_ref: (seq, hidden) hidden-state sequence."""
    seq, hidden = out_ref.shape
    four_h = 4 * hidden
    n_rows = packed_ref.shape[0]
    in_size = n_rows - seq - hidden - 1

    p = packed_ref[...]                                   # (seq + I + H + 1, 4H)
    x = p[0:seq, :]                                       # (seq, 4H), cols >= I are 0
    wih_rows = [p[seq + k:seq + k + 1, :] for k in range(in_size)]        # (1, 4H)
    whh_rows = [p[seq + in_size + k:seq + in_size + k + 1, :]
                for k in range(hidden)]                                   # (1, 4H)
    bias = p[seq + in_size + hidden:seq + in_size + hidden + 1, :]        # (1, 4H)

    # Input projection for ALL timesteps, hoisted out of the recurrence.
    # Tiny static I -> fully unrolled broadcast FMAs on the VPU (no MXU).
    xproj = jnp.broadcast_to(bias, (seq, four_h))
    for k in range(in_size):
        xproj = xproj + x[:, k:k + 1] * wih_rows[k]       # (seq, 4H)

    h = jnp.zeros((1, hidden), jnp.float32)
    c = jnp.zeros((1, hidden), jnp.float32)

    hs = []
    # seq / hidden are tiny static ints -> fully unrolled.
    for t in range(seq):
        gates = xproj[t:t + 1, :]                         # (1, 4H)
        for k in range(hidden):                           # 2 FMAs/step on the chain
            gates = gates + h[:, k:k + 1] * whh_rows[k]

        sig = jax.nn.sigmoid(gates)                       # one EUP pass for i,f,o
        tnh = jnp.tanh(gates)                             # one EUP pass for g
        i_g = sig[:, 0 * hidden:1 * hidden]
        f_g = sig[:, 1 * hidden:2 * hidden]
        g_g = tnh[:, 2 * hidden:3 * hidden]
        o_g = sig[:, 3 * hidden:4 * hidden]

        c = f_g * c + i_g * g_g
        h = o_g * jnp.tanh(c)
        hs.append(h)

    # Single output store after the recurrence.
    out_ref[...] = jnp.concatenate(hs, axis=0)


def pack_lstm_params(w_ih, w_hh, b_ih, b_hh):
    """Build the (I + H + 1, 4H) parameter block ONCE (not per forward call)."""
    four_h = w_ih.shape[0]
    return jnp.concatenate(
        [jnp.transpose(w_ih).astype(jnp.float32),          # (I, 4H)
         jnp.transpose(w_hh).astype(jnp.float32),          # (H, 4H)
         (b_ih + b_hh).reshape(1, four_h).astype(jnp.float32)],  # (1, 4H)
        axis=0)


def lstm_pallas(x_seq, param_block):
    """Single-layer LSTM over one sequence, zero initial state, inside Pallas."""
    seq, in_size = x_seq.shape
    four_h = param_block.shape[1]
    hidden = four_h // 4

    # Pad x to 4H columns and stack on top of the parameter block -> ONE input.
    x_pad = jnp.zeros((seq, four_h), jnp.float32)
    x_pad = x_pad.at[:, :in_size].set(x_seq.astype(jnp.float32))
    packed = jnp.concatenate([x_pad, param_block], axis=0)  # (seq + I + H + 1, 4H)

    vmem = pl.BlockSpec(memory_space=pltpu.MemorySpace.VMEM)
    return pl.pallas_call(
        lstm_kernel,
        out_shape=jax.ShapeDtypeStruct((seq, hidden), jnp.float32),
        in_specs=[vmem],
        out_specs=vmem,
    )(packed)


@jax.jit
def model_forward(x1, param_block):
    """Reproduces Model.forward: returns output[0] of the LSTM, shape (seq, hidden).
    The Model always passes a zero initial state, which the kernel assumes."""
    x_seq = x1[0]                                  # (seq, input_size), batch element 0
    return lstm_pallas(x_seq, param_block)


def lstm_reference(x_seq, w_ih, w_hh, b_ih, b_hh):
    """Pure-JAX reference (PyTorch LSTM semantics, gate order i,f,g,o)."""
    hidden = w_hh.shape[1]
    h = jnp.zeros((hidden,), jnp.float32)
    c = jnp.zeros((hidden,), jnp.float32)
    outs = []
    for t in range(x_seq.shape[0]):
        gates = w_ih @ x_seq[t] + b_ih + w_hh @ h + b_hh
        i_g = jax.nn.sigmoid(gates[0 * hidden:1 * hidden])
        f_g = jax.nn.sigmoid(gates[1 * hidden:2 * hidden])
        g_g = jnp.tanh(gates[2 * hidden:3 * hidden])
        o_g = jax.nn.sigmoid(gates[3 * hidden:4 * hidden])
        c = f_g * c + i_g * g_g
        h = o_g * jnp.tanh(c)
        outs.append(h)
    return jnp.stack(outs, axis=0)


if __name__ == "__main__":
    input_size = 2
    hidden_size = 2

    # Deterministic parameter init (PyTorch LSTM default: U(-1/sqrt(H), 1/sqrt(H))).
    key = jax.random.PRNGKey(0)
    kx, k1, k2, k3, k4 = jax.random.split(key, 5)
    std = 1.0 / math.sqrt(hidden_size)
    w_ih = jax.random.uniform(k1, (4 * hidden_size, input_size),
                              minval=-std, maxval=std, dtype=jnp.float32)
    w_hh = jax.random.uniform(k2, (4 * hidden_size, hidden_size),
                              minval=-std, maxval=std, dtype=jnp.float32)
    b_ih = jax.random.uniform(k3, (4 * hidden_size,),
                              minval=-std, maxval=std, dtype=jnp.float32)
    b_hh = jax.random.uniform(k4, (4 * hidden_size,),
                              minval=-std, maxval=std, dtype=jnp.float32)

    # Parameter block built once, outside the per-call path.
    param_block = pack_lstm_params(w_ih, w_hh, b_ih, b_hh)

    # Input as in the PyTorch script: x1 = torch.randn(1, 2, 2)  (batch, seq, input).
    x1 = jax.random.normal(kx, (1, 2, 2), dtype=jnp.float32)

    out = model_forward(x1, param_block)
    out = jax.block_until_ready(out)

    ref = lstm_reference(x1[0], w_ih, w_hh, b_ih, b_hh)
    assert out.shape == (2, 2), out.shape
    assert jnp.allclose(out, ref, atol=1e-5, rtol=1e-5), (out, ref)

    print("KERNEL_OK")
</pallas_src>

<mosaic_0001>
module attributes {stable_mosaic.version = 11 : i64} {
  func.func @lstm_kernel(%arg0: memref<7x8xf32, #tpu.memory_space<vmem>>, %arg1: memref<2x2xf32, #tpu.memory_space<vmem>>) attributes {dimension_semantics = [], scalar_prefetch = 0 : i64, scratch_operands = 0 : i64, tpu.core_type = #tpu.core_type<tc>} {
    %c0 = arith.constant 0 : index
    %c0_0 = arith.constant 0 : index
    %0 = vector.load %arg0[%c0, %c0_0] : memref<7x8xf32, #tpu.memory_space<vmem>>, vector<7x8xf32>
    %1 = vector.extract_strided_slice %0 {offsets = [0, 0], sizes = [2, 8], strides = [1, 1]} : vector<7x8xf32> to vector<2x8xf32>
    %2 = vector.extract_strided_slice %0 {offsets = [2, 0], sizes = [1, 8], strides = [1, 1]} : vector<7x8xf32> to vector<1x8xf32>
    %3 = vector.extract_strided_slice %0 {offsets = [3, 0], sizes = [1, 8], strides = [1, 1]} : vector<7x8xf32> to vector<1x8xf32>
    %4 = vector.extract_strided_slice %0 {offsets = [4, 0], sizes = [1, 8], strides = [1, 1]} : vector<7x8xf32> to vector<1x8xf32>
    %5 = vector.extract_strided_slice %0 {offsets = [5, 0], sizes = [1, 8], strides = [1, 1]} : vector<7x8xf32> to vector<1x8xf32>
    %6 = vector.extract_strided_slice %0 {offsets = [6, 0], sizes = [1, 8], strides = [1, 1]} : vector<7x8xf32> to vector<1x8xf32>
    %7 = vector.shape_cast %6 : vector<1x8xf32> to vector<1x8xf32>
    %8 = vector.broadcast %7 : vector<1x8xf32> to vector<2x8xf32>
    %9 = vector.extract_strided_slice %1 {offsets = [0, 0], sizes = [2, 1], strides = [1, 1]} : vector<2x8xf32> to vector<2x1xf32>
    %10 = vector.broadcast %9 : vector<2x1xf32> to vector<2x8xf32>
    %11 = vector.broadcast %2 : vector<1x8xf32> to vector<2x8xf32>
    %12 = arith.mulf %10, %11 : vector<2x8xf32>
    %13 = arith.addf %8, %12 : vector<2x8xf32>
    %14 = vector.extract_strided_slice %1 {offsets = [0, 1], sizes = [2, 1], strides = [1, 1]} : vector<2x8xf32> to vector<2x1xf32>
    %15 = vector.broadcast %14 : vector<2x1xf32> to vector<2x8xf32>
    %16 = vector.broadcast %3 : vector<1x8xf32> to vector<2x8xf32>
    %17 = arith.mulf %15, %16 : vector<2x8xf32>
    %18 = arith.addf %13, %17 : vector<2x8xf32>
    %cst = arith.constant 0.000000e+00 : f32
    %19 = vector.broadcast %cst : f32 to vector<1x2xf32>
    %cst_1 = arith.constant 0.000000e+00 : f32
    %20 = vector.broadcast %cst_1 : f32 to vector<1x2xf32>
    %21 = vector.extract_strided_slice %18 {offsets = [0, 0], sizes = [1, 8], strides = [1, 1]} : vector<2x8xf32> to vector<1x8xf32>
    %22 = vector.extract_strided_slice %19 {offsets = [0, 0], sizes = [1, 1], strides = [1, 1]} : vector<1x2xf32> to vector<1x1xf32>
    %23 = vector.broadcast %22 : vector<1x1xf32> to vector<1x8xf32>
    %24 = arith.mulf %23, %4 : vector<1x8xf32>
    %25 = arith.addf %21, %24 : vector<1x8xf32>
    %26 = vector.extract_strided_slice %19 {offsets = [0, 1], sizes = [1, 1], strides = [1, 1]} : vector<1x2xf32> to vector<1x1xf32>
    %27 = vector.broadcast %26 : vector<1x1xf32> to vector<1x8xf32>
    %28 = arith.mulf %27, %5 : vector<1x8xf32>
    %29 = arith.addf %25, %28 : vector<1x8xf32>
    %30 = arith.negf %29 : vector<1x8xf32>
    %31 = math.exp %30 : vector<1x8xf32>
    %cst_2 = arith.constant 1.000000e+00 : f32
    %32 = vector.broadcast %cst_2 : f32 to vector<1x8xf32>
    %33 = arith.addf %32, %31 : vector<1x8xf32>
    %34 = arith.divf %32, %33 : vector<1x8xf32>
    %35 = math.tanh %29 : vector<1x8xf32>
    %36 = vector.extract_strided_slice %34 {offsets = [0, 0], sizes = [1, 2], strides = [1, 1]} : vector<1x8xf32> to vector<1x2xf32>
    %37 = vector.extract_strided_slice %34 {offsets = [0, 2], sizes = [1, 2], strides = [1, 1]} : vector<1x8xf32> to vector<1x2xf32>
    %38 = vector.extract_strided_slice %35 {offsets = [0, 4], sizes = [1, 2], strides = [1, 1]} : vector<1x8xf32> to vector<1x2xf32>
    %39 = vector.extract_strided_slice %34 {offsets = [0, 6], sizes = [1, 2], strides = [1, 1]} : vector<1x8xf32> to vector<1x2xf32>
    %40 = arith.mulf %37, %20 : vector<1x2xf32>
    %41 = arith.mulf %36, %38 : vector<1x2xf32>
    %42 = arith.addf %40, %41 : vector<1x2xf32>
    %43 = math.tanh %42 : vector<1x2xf32>
    %44 = arith.mulf %39, %43 : vector<1x2xf32>
    %45 = vector.extract_strided_slice %18 {offsets = [1, 0], sizes = [1, 8], strides = [1, 1]} : vector<2x8xf32> to vector<1x8xf32>
    %46 = vector.extract_strided_slice %44 {offsets = [0, 0], sizes = [1, 1], strides = [1, 1]} : vector<1x2xf32> to vector<1x1xf32>
    %47 = vector.broadcast %46 : vector<1x1xf32> to vector<1x8xf32>
    %48 = arith.mulf %47, %4 : vector<1x8xf32>
    %49 = arith.addf %45, %48 : vector<1x8xf32>
    %50 = vector.extract_strided_slice %44 {offsets = [0, 1], sizes = [1, 1], strides = [1, 1]} : vector<1x2xf32> to vector<1x1xf32>
    %51 = vector.broadcast %50 : vector<1x1xf32> to vector<1x8xf32>
    %52 = arith.mulf %51, %5 : vector<1x8xf32>
    %53 = arith.addf %49, %52 : vector<1x8xf32>
    %54 = arith.negf %53 : vector<1x8xf32>
    %55 = math.exp %54 : vector<1x8xf32>
    %cst_3 = arith.constant 1.000000e+00 : f32
    %56 = vector.broadcast %cst_3 : f32 to vector<1x8xf32>
    %57 = arith.addf %56, %55 : vector<1x8xf32>
    %58 = arith.divf %56, %57 : vector<1x8xf32>
    %59 = math.tanh %53 : vector<1x8xf32>
    %60 = vector.extract_strided_slice %58 {offsets = [0, 0], sizes = [1, 2], strides = [1, 1]} : vector<1x8xf32> to vector<1x2xf32>
    %61 = vector.extract_strided_slice %58 {offsets = [0, 2], sizes = [1, 2], strides = [1, 1]} : vector<1x8xf32> to vector<1x2xf32>
    %62 = vector.extract_strided_slice %59 {offsets = [0, 4], sizes = [1, 2], strides = [1, 1]} : vector<1x8xf32> to vector<1x2xf32>
    %63 = vector.extract_strided_slice %58 {offsets = [0, 6], sizes = [1, 2], strides = [1, 1]} : vector<1x8xf32> to vector<1x2xf32>
    %64 = arith.mulf %61, %42 : vector<1x2xf32>
    %65 = arith.mulf %60, %62 : vector<1x2xf32>
    %66 = arith.addf %64, %65 : vector<1x2xf32>
    %67 = math.tanh %66 : vector<1x2xf32>
    %68 = arith.mulf %63, %67 : vector<1x2xf32>
    %69 = tpu.concatenate %44, %68 in 0 : vector<1x2xf32>, vector<1x2xf32> -> vector<2x2xf32>
    %c0_4 = arith.constant 0 : index
    %c0_5 = arith.constant 0 : index
    %70 = vector.load %arg1[%c0_4, %c0_5] : memref<2x2xf32, #tpu.memory_space<vmem>>, vector<2x2xf32>
    tpu.vector_store %arg1[%c0_4, %c0_5], %69 {strides = array<i32>} : memref<2x2xf32, #tpu.memory_space<vmem>>, vector<2x2xf32>,
    return
  }
}

</mosaic_0001>

<bundles_post_ra>
// kernel: model_forward.1
= control target key start
LH: loop header
LB: loop body
LE: loop exit
PB: predicated region body
PF: predicated region fallthrough
CT: control target
= control target key end

     0   :  { %s245_s0 = inlined_call_operand.vmem [shape: f32[7,8], index: 0, kind: input, shape index: {}]   ;;  %s246_s1 = inlined_call_operand.hbm [shape: f32[2,2], index: 1, kind: output, shape index: {}]  }
   0x1   :  { %v217_v0 = vld [vmem:[%s245_s0] sm:$0x7f] }
   0x2   :  { %6 = vsyncpa [#allocation3], 0  ;;  %v195_v1 = vmov 0   ;;  %v196_v2 = vmov 1   ;;  %v10_v3 = vlaneseq  ;;  %v35_v13 = vmul.f32 0.0, %v217_v0  ;;  %s197_s0 = smov 124  }
   0x3   :  { %150 = vset.pattern.permute.xlu0 %v195_v1  ;;  %s198_s8 = smov 2   ;;  %v199_v32 = vmov 7   ;;  %v200_v33 = vmov 6   ;;  %s201_s9 = smov 4   ;;  %v83_v37 = vrot.slane %v217_v0, 5  ;;  %v72_v38 = vrot.slane %v217_v0, 4 }
   0x4   :  { %16 = vperm.xlu0 %150, %v217_v0   ;;  %v11_v4 = vshrl.u32 %v10_v3, 7  ;;  %v37_v17 = vrot.slane %v35_v13, 4  ;;  %v40_v19 = vrot.slane %v35_v13, 5  ;;  %153 = vset.pattern.permute.xlu1 %v199_v32  ;;  %vm117_vm0 = vcmask 1040384   ;;  %s202_s10 = smov 122   ;;  %s203_s11 = smov [#allocation2]  }
   0x5   :  { %s131_s12 = sshll.u32 %s203_s11, 4  ;;  %vm123_vm1 = vcmask 9216   ;;  %s132_s12 = int_to_ptr.vmem [resolvable:$true] %s131_s12 }
   0x6   :  { %v21_v5 = vsub.s32 2, %v11_v4  ;;  %v12_v6 = vsub.s32 6, %v11_v4  ;;  %v31_v8 = vsub.s32 3, %v11_v4  ;;  %s171_s13 = scalar_lea.vmem %s132_s12, 32  ;;  %p176_p1 = scmp.lt.s32.totalorder %s132_s12, %s132_s12 }
   0x7   :  { %p172_p0 = scmp.ne.s32.totalorder %s132_s12, %s171_s13  ;;  %p177_p2 = scmp.lt.s32.totalorder %s171_s13, %s171_s13 }
   0x8   :  { %151 = vset.pattern.permute.xlu0 %v196_v2  ;;  %v22_v7 = vrot.slane %v217_v0, %v21_v5  ;;  %v13_v10 = vrot.slane %v217_v0, %v12_v6  ;;  %v32_v12 = vrot.slane %v217_v0, %v31_v8 }
   0x9   :  { %26 = vperm.xlu0 %151, %v217_v0   ;;  %p178_p3 = por %p177_p2, %p176_p1 }
   0xb   :  { %p179_p4 = pnand %p178_p3, %p172_p0 }
   0xd   :  { %152 = vset.pattern.permute.xlu0 %v200_v33 }
  0x83   :  { %v17_v9 = vpop.permute.xlu0 %16 }
  0x84   :  { %v23_v11 = vmul.f32 %v22_v7, %v17_v9 }
  0x86   :  { %v24_v15 = vadd.f32 %v23_v11, %v13_v10 }
  0x88   :  { %v27_v14 = vpop.permute.xlu0 %26 }
  0x89   :  { %v33_v16 = vmul.f32 %v32_v12, %v27_v14 }
  0x8b   :  { %v34_v18 = vadd.f32 %v33_v16, %v24_v15 }
  0x8d   :  { %v39_v20 = vadd.f32 %v37_v17, %v34_v18 }
  0x8f   :  { %v42_v21 = vadd.f32 %v40_v19, %v39_v20 }
  0x91   :  { %155 = vtanh.f32 %v42_v21  ;;  %v139_v23 = vmul.f32 -1.442695, %v42_v21 }
  0x93   :  { %157 = vpow2.f32 %v139_v23 }
  0x9b   :  { %v156_v22 = vpop.eup %155 }
  0x9c   :  { %52 = vrot.lane.b32.xlu1 %v156_v22, %s197_s0 }
  0x9d   :  { %v158_v24 = vpop.eup %157 }
  0x9e   :  { %v46_v25 = vadd.f32 1.0, %v158_v24 }
  0xa0   :  { %159 = vrcp.f32 %v46_v25 }
  0xaa   :  { %v160_v26 = vpop.eup %159 }
  0xab   :  { %v50_v29 = vmul.f32 0.0, %v160_v26 }
 0x10e   :  { %v53_v27 = vpop.permute.xlu1 %52 }
 0x10f   :  { %v55_v28 = vmul.f32 %v160_v26, %v53_v27 }
 0x111   :  { %57 = vrot.lane.b32.xlu1 %v55_v28, %s198_s8 }
 0x183   :  { %v58_v30 = vpop.permute.xlu1 %57 }
 0x184   :  { %v60_v31 = vadd.f32 %v58_v30, %v50_v29 }
 0x186   :  { %161 = vtanh.f32 %v60_v31  ;;  %v98_v54 = vrot.slane %v60_v31, 7 }
 0x190   :  { %v162_v34 = vpop.eup %161 }
 0x191   :  { %63 = vrot.lane.b32.xlu1 %v162_v34, %s201_s9 }
 0x203   :  { %v64_v35 = vpop.permute.xlu1 %63 }
 0x204   :  { %v66_v36 = vmul.f32 %v160_v26, %v64_v35 }
 0x206   :  { %80 = vperm.xlu1 %153, %v66_v36   ;;  %69 = vperm.xlu0 %152, %v66_v36  }
 0x20a   :  { %154 = vset.pattern.permute.xlu0 %v199_v32 }
 0x285   :  { %v81_v39 = vpop.permute.xlu1 %80  ;;  %v70_v40 = vpop.permute.xlu0 %69 }
 0x286   :  { %v85_v41 = vmul.f32 %v83_v37, %v81_v39  ;;  %v74_v42 = vmul.f32 %v72_v38, %v70_v40 }
 0x288   :  { %v76_v43 = vrot.slane %v74_v42, 7  ;;  %v87_v44 = vrot.slane %v85_v41, 7 }
 0x28a   :  { %v78_v45 = vadd.f32 %v76_v43, %v34_v18 }
 0x28c   :  { %v89_v46 = vadd.f32 %v87_v44, %v78_v45 }
 0x28e   :  { %163 = vtanh.f32 %v89_v46  ;;  %v140_v48 = vmul.f32 -1.442695, %v89_v46 }
 0x290   :  { %165 = vpow2.f32 %v140_v48 }
 0x298   :  { %v164_v47 = vpop.eup %163 }
 0x299   :  { %102 = vrot.lane.b32.xlu1 %v164_v47, %s197_s0 }
 0x29a   :  { %v166_v49 = vpop.eup %165 }
 0x29b   :  { %v93_v50 = vadd.f32 1.0, %v166_v49 }
 0x29d   :  { %167 = vrcp.f32 %v93_v50 }
 0x2a7   :  { %v168_v51 = vpop.eup %167 }
 0x2a8   :  { %v100_v55 = vmul.f32 %v168_v51, %v98_v54 }
 0x30b   :  { %v103_v52 = vpop.permute.xlu1 %102 }
 0x30c   :  { %v105_v53 = vmul.f32 %v168_v51, %v103_v52 }
 0x30e   :  { %107 = vrot.lane.b32.xlu0 %v105_v53, %s198_s8 }
 0x380   :  { %v108_v56 = vpop.permute.xlu0 %107 }
 0x381   :  { %v110_v57 = vadd.f32 %v108_v56, %v100_v55 }
 0x383   :  { %169 = vtanh.f32 %v110_v57 }
 0x38d   :  { %v170_v58 = vpop.eup %169 }
 0x38e   :  { %113 = vrot.lane.b32.xlu1 %v170_v58, %s201_s9 }
 0x400   :  { %v114_v59 = vpop.permute.xlu1 %113 }
 0x401   :  { %v116_v60 = vmul.f32 %v168_v51, %v114_v59 }
 0x403   :  { %v118_v61 = vsel %vm117_vm0, %v66_v36, %v116_v60 }
 0x404   :  { %120 = vrot.lane.b32.xlu0 %v118_v61, %s202_s10 }
 0x476   :  { %v121_v62 = vpop.permute.xlu0 %120 }
 0x477   :  { %124 = vst.msk [vmem:[#allocation2] sm:$0x3] %vm123_vm1, %v121_v62 }
 0x478   :  { %182 = shalt.err (!%p179_p4)
}
 0x479   :  { %s183_s16 = scalar_lea.hbm %s246_s1, 32 }
 0x47a   :  { %p184_p5 = scmp.ne.s32.totalorder %s246_s1, %s183_s16  ;;  %p187_p6 = scmp.lt.u32.totalorder %s183_s16, %s246_s1 }
 0x47c   :  { %p189_p7 = pnand %p187_p6, %p184_p5 }
 0x47e   :  { %192 = shalt.err (!%p189_p7)
}
 0x47f   :  { %134 = dma.vmem_to_hbm [thread:$0]  %s132_s12, 32, %s246_s1, [#allocation3]  }
 0x480   :  { %193 = dma.done.wait [#allocation3], 32  }
 0x481   :  { %194 = vsyncadd [#allocation3], 4294967264 }
 0x482   :  { %138 = vsyncpa [#allocation3], 1 }

</bundles_post_ra>
